<compile_context>
chip_gen: v7x
topology: tpu7x:2x2x1
jax: 0.10.0
libtpu: 0.0.40
codegen_flags: <defaults>
</compile_context>

<pallas_src>
import functools

import jax
import jax.numpy as jnp
from jax.experimental import pallas as pl
from jax.experimental.pallas import tpu as pltpu


def role_classification_kernel(q_ref, w1_ref, b1_ref, w2_ref, b2_ref, k_ref, out_ref):
    # Linear 1: bf16 MXU matmul, f32 accumulate; bias + ReLU in f32 on the VPU.
    h = jnp.dot(q_ref[...], w1_ref[...], preferred_element_type=jnp.float32) + b1_ref[...]
    h = jnp.maximum(h, 0.0)

    # Linear 2 + Tanh (tanh runs on the EUP, kept in f32).
    Q = jnp.tanh(
        jnp.dot(h.astype(w2_ref.dtype), w2_ref[...], preferred_element_type=jnp.float32)
        + b2_ref[...]
    )

    # out[b, n] = sum_d Q[b, d] * k[n, d]  -- contraction on both last dims, no transpose.
    out_ref[...] = jax.lax.dot_general(
        Q.astype(k_ref.dtype),
        k_ref[...],
        dimension_numbers=(((1,), (1,)), ((), ())),
        preferred_element_type=jnp.float32,
    ).astype(out_ref.dtype)


@functools.partial(jax.jit, static_argnames=("block_b",))
def role_classification(q, w1, b1, w2, b2, k, *, block_b=128):
    B, Dq = q.shape
    N, Dk = k.shape
    assert w1.shape == (Dq, Dq)
    assert b1.shape == (1, Dq)
    assert w2.shape == (Dq, Dk)
    assert b2.shape == (1, Dk)

    # Batch tile: a multiple of 8 (sublane count), capped at block_b.  Pad B up so
    # the grid divides evenly; sliced back off at the end.
    tb = min(block_b, max(8, pl.cdiv(B, 8) * 8))
    tb = pl.cdiv(tb, 8) * 8
    b_pad = pl.cdiv(B, tb) * tb
    if b_pad != B:
        q = jnp.pad(q, ((0, b_pad - B), (0, 0)))

    # bf16 operands for the MXU (f32 accumulation inside the kernel); biases stay f32.
    compute_dtype = jnp.bfloat16
    qc = q.astype(compute_dtype)
    w1c = w1.astype(compute_dtype)
    w2c = w2.astype(compute_dtype)
    kc = k.astype(compute_dtype)

    grid = (b_pad // tb,)
    resident = lambda shape: pl.BlockSpec(shape, lambda i: (0, 0))  # VMEM-resident params

    out = pl.pallas_call(
        role_classification_kernel,
        out_shape=jax.ShapeDtypeStruct((b_pad, N), jnp.float32),
        grid=grid,
        in_specs=[
            pl.BlockSpec((tb, Dq), lambda i: (i, 0)),  # q   : tiled over batch
            resident((Dq, Dq)),                        # W1
            resident((1, Dq)),                         # b1
            resident((Dq, Dk)),                        # W2
            resident((1, Dk)),                         # b2
            resident((N, Dk)),                         # k
        ],
        out_specs=pl.BlockSpec((tb, N), lambda i: (i, 0)),
        compiler_params=pltpu.CompilerParams(
            dimension_semantics=("parallel",),
        ),
    )(qc, w1c, b1, w2c, b2, kc)

    return out[:B]


def reference_f32(q, w1, b1, w2, b2, k):
    h = jnp.maximum(q @ w1 + b1, 0.0)
    Q = jnp.tanh(h @ w2 + b2)
    return Q @ k.T


if __name__ == "__main__":
    # Small shapes consistent with the module's forward.
    B, Dq, Dk, N = 4, 32, 16, 8

    key = jax.random.PRNGKey(0)
    kq, kw1, kb1, kw2, kb2, kk = jax.random.split(key, 6)

    # Deterministic synthetic parameters (PyTorch-Linear-style uniform scale).
    s1 = 1.0 / jnp.sqrt(Dq)
    q = jax.random.normal(kq, (B, Dq), dtype=jnp.float32)
    w1 = jax.random.uniform(kw1, (Dq, Dq), minval=-s1, maxval=s1, dtype=jnp.float32)
    b1 = jax.random.uniform(kb1, (1, Dq), minval=-s1, maxval=s1, dtype=jnp.float32)
    w2 = jax.random.uniform(kw2, (Dq, Dk), minval=-s1, maxval=s1, dtype=jnp.float32)
    b2 = jax.random.uniform(kb2, (1, Dk), minval=-s1, maxval=s1, dtype=jnp.float32)
    k = jax.random.normal(kk, (N, Dk), dtype=jnp.float32)

    out = role_classification(q, w1, b1, w2, b2, k)
    out = jax.block_until_ready(out)

    ref = reference_f32(q, w1, b1, w2, b2, k)
    assert out.shape == (B, N), out.shape
    # bf16 MXU operands -> loosened tolerance vs. the pure-f32 reference.
    assert jnp.allclose(out, ref, atol=3e-2, rtol=3e-2), float(jnp.abs(out - ref).max())

    print("KERNEL_OK")
</pallas_src>

<mosaic_0001>
module attributes {stable_mosaic.version = 11 : i64} {
  func.func @role_classification_kernel(%arg0: i32, %arg1: memref<8x32xbf16, #tpu.memory_space<vmem>>, %arg2: memref<32x32xbf16, #tpu.memory_space<vmem>>, %arg3: memref<1x32xf32, #tpu.memory_space<vmem>>, %arg4: memref<32x16xbf16, #tpu.memory_space<vmem>>, %arg5: memref<1x16xf32, #tpu.memory_space<vmem>>, %arg6: memref<8x16xbf16, #tpu.memory_space<vmem>>, %arg7: memref<8x8xf32, #tpu.memory_space<vmem>>) attributes {dimension_semantics = [#tpu.dimension_semantics<parallel>], iteration_bounds = array<i64: 1>, scalar_prefetch = 0 : i64, scratch_operands = 0 : i64, tpu.core_type = #tpu.core_type<tc>, window_params = [{transform_indices = @transform_0, window_bounds = array<i64: 8, 32>}, {pipeline_mode = #tpu.pipeline_mode<synchronous>, transform_indices = @transform_1, window_bounds = array<i64: 32, 32>}, {pipeline_mode = #tpu.pipeline_mode<synchronous>, transform_indices = @transform_2, window_bounds = array<i64: 1, 32>}, {pipeline_mode = #tpu.pipeline_mode<synchronous>, transform_indices = @transform_3, window_bounds = array<i64: 32, 16>}, {pipeline_mode = #tpu.pipeline_mode<synchronous>, transform_indices = @transform_4, window_bounds = array<i64: 1, 16>}, {pipeline_mode = #tpu.pipeline_mode<synchronous>, transform_indices = @transform_5, window_bounds = array<i64: 8, 16>}, {transform_indices = @transform_6, window_bounds = array<i64: 8, 8>}]} {
    %c0 = arith.constant 0 : index
    %c0_0 = arith.constant 0 : index
    %0 = vector.load %arg1[%c0, %c0_0] : memref<8x32xbf16, #tpu.memory_space<vmem>>, vector<8x32xbf16>
    %c0_1 = arith.constant 0 : index
    %c0_2 = arith.constant 0 : index
    %1 = vector.load %arg2[%c0_1, %c0_2] : memref<32x32xbf16, #tpu.memory_space<vmem>>, vector<32x32xbf16>
    %cst = arith.constant dense<0.000000e+00> : vector<8x32xf32>
    %2 = tpu.matmul %0, %1, %cst {dimension_numbers = #tpu.dot_dimension_numbers<[1], [0], [0], [1], [0, 0, 1, 1], [], []>} : vector<8x32xbf16>, vector<32x32xbf16>, vector<8x32xf32> -> vector<8x32xf32>
    %c0_3 = arith.constant 0 : index
    %c0_4 = arith.constant 0 : index
    %3 = vector.load %arg3[%c0_3, %c0_4] : memref<1x32xf32, #tpu.memory_space<vmem>>, vector<1x32xf32>
    %4 = vector.broadcast %3 : vector<1x32xf32> to vector<8x32xf32>
    %5 = arith.addf %2, %4 : vector<8x32xf32>
    %cst_5 = arith.constant 0.000000e+00 : f32
    %6 = vector.broadcast %cst_5 : f32 to vector<8x32xf32>
    %7 = arith.maximumf %5, %6 : vector<8x32xf32>
    %8 = arith.truncf %7 : vector<8x32xf32> to vector<8x32xbf16>
    %c0_6 = arith.constant 0 : index
    %c0_7 = arith.constant 0 : index
    %9 = vector.load %arg4[%c0_6, %c0_7] : memref<32x16xbf16, #tpu.memory_space<vmem>>, vector<32x16xbf16>
    %cst_8 = arith.constant dense<0.000000e+00> : vector<8x16xf32>
    %10 = tpu.matmul %8, %9, %cst_8 {dimension_numbers = #tpu.dot_dimension_numbers<[1], [0], [0], [1], [0, 0, 1, 1], [], []>} : vector<8x32xbf16>, vector<32x16xbf16>, vector<8x16xf32> -> vector<8x16xf32>
    %c0_9 = arith.constant 0 : index
    %c0_10 = arith.constant 0 : index
    %11 = vector.load %arg5[%c0_9, %c0_10] : memref<1x16xf32, #tpu.memory_space<vmem>>, vector<1x16xf32>
    %12 = vector.broadcast %11 : vector<1x16xf32> to vector<8x16xf32>
    %13 = arith.addf %10, %12 : vector<8x16xf32>
    %14 = math.tanh %13 : vector<8x16xf32>
    %15 = arith.truncf %14 : vector<8x16xf32> to vector<8x16xbf16>
    %c0_11 = arith.constant 0 : index
    %c0_12 = arith.constant 0 : index
    %16 = vector.load %arg6[%c0_11, %c0_12] : memref<8x16xbf16, #tpu.memory_space<vmem>>, vector<8x16xbf16>
    %cst_13 = arith.constant dense<0.000000e+00> : vector<8x8xf32>
    %17 = tpu.matmul %15, %16, %cst_13 {dimension_numbers = #tpu.dot_dimension_numbers<[1], [1], [0], [0], [0, 0, 1, 0], [], []>} : vector<8x16xbf16>, vector<8x16xbf16>, vector<8x8xf32> -> vector<8x8xf32>
    %c0_14 = arith.constant 0 : index
    %c0_15 = arith.constant 0 : index
    %18 = vector.load %arg7[%c0_14, %c0_15] : memref<8x8xf32, #tpu.memory_space<vmem>>, vector<8x8xf32>
    tpu.vector_store %arg7[%c0_14, %c0_15], %17 {strides = array<i32>} : memref<8x8xf32, #tpu.memory_space<vmem>>, vector<8x8xf32>,
    return
  }
  func.func @transform_0(%arg0: i32) -> (i32, i32) {
    %c0_i32 = arith.constant 0 : i32
    %c0_i32_0 = arith.constant 0 : i32
    return %arg0, %c0_i32 : i32, i32
  }
  func.func @transform_1(%arg0: i32) -> (i32, i32) {
    %c0_i32 = arith.constant 0 : i32
    %c0_i32_0 = arith.constant 0 : i32
    %c0_i32_1 = arith.constant 0 : i32
    return %c0_i32, %c0_i32_0 : i32, i32
  }
  func.func @transform_2(%arg0: i32) -> (i32, i32) {
    %c0_i32 = arith.constant 0 : i32
    %c0_i32_0 = arith.constant 0 : i32
    %c0_i32_1 = arith.constant 0 : i32
    return %c0_i32, %c0_i32_0 : i32, i32
  }
  func.func @transform_3(%arg0: i32) -> (i32, i32) {
    %c0_i32 = arith.constant 0 : i32
    %c0_i32_0 = arith.constant 0 : i32
    %c0_i32_1 = arith.constant 0 : i32
    return %c0_i32, %c0_i32_0 : i32, i32
  }
  func.func @transform_4(%arg0: i32) -> (i32, i32) {
    %c0_i32 = arith.constant 0 : i32
    %c0_i32_0 = arith.constant 0 : i32
    %c0_i32_1 = arith.constant 0 : i32
    return %c0_i32, %c0_i32_0 : i32, i32
  }
  func.func @transform_5(%arg0: i32) -> (i32, i32) {
    %c0_i32 = arith.constant 0 : i32
    %c0_i32_0 = arith.constant 0 : i32
    %c0_i32_1 = arith.constant 0 : i32
    return %c0_i32, %c0_i32_0 : i32, i32
  }
  func.func @transform_6(%arg0: i32) -> (i32, i32) {
    %c0_i32 = arith.constant 0 : i32
    %c0_i32_0 = arith.constant 0 : i32
    return %arg0, %c0_i32 : i32, i32
  }
}

</mosaic_0001>

<bundles_post_ra>
// kernel: role_classification.1
= control target key start
LH: loop header
LB: loop body
LE: loop exit
PB: predicated region body
PF: predicated region fallthrough
CT: control target
= control target key end

     0   :  { %v263_v0 = vmov 0.0   ;;  %vm264_vm0 = vmmov 0   ;;  %vm48_vm1 = vcmask 261120   ;;  %vm163_vm2 = vcmask 130048   ;;  %s329_s1 = inlined_call_operand.vmem [shape: bf16[32,32], index: 1, kind: input, shape index: {}]   ;;  %s330_s0 = inlined_call_operand.vmem [shape: bf16[8,32], index: 0, kind: input, shape index: {}]   ;;  %s331_s3 = inlined_call_operand.vmem [shape: bf16[32,16], index: 3, kind: input, shape index: {}]   ;;  %s332_s2 = inlined_call_operand.vmem [shape: f32[1,32], index: 2, kind: input, shape index: {}]   ;;  %s333_s5 = inlined_call_operand.vmem [shape: bf16[8,16], index: 5, kind: input, shape index: {}]   ;;  %s334_s4 = inlined_call_operand.vmem [shape: f32[1,16], index: 4, kind: input, shape index: {}]   ;;  %s335_s6 = inlined_call_operand.vmem [shape: f32[8,8], index: 6, kind: output, shape index: {}]  }
   0x1   :  { %233 = vmatprep.subr.bf16.mxu0 %v263_v0  ;;  %v257_v1 = vld [vmem:[%s329_s1] sm:$0xff]   ;;  %237 = vmatprep.mubr.msk.bf16.mxu0 %vm264_vm0, %v263_v0  ;;  %v258_v2 = vld [vmem:[%s329_s1 + $0x8] sm:$0xff]   ;;  %vm210_vm3 = vcmask 64512  }
   0x2   :  { %241 = vmatprep.subr.bf16.mxu1 %v263_v0  ;;  %245 = vmatprep.mubr.msk.bf16.mxu1 %vm264_vm0, %v263_v0  ;;  %v24_v3 = vld [vmem:[%s330_s0] sm:$0xf]  ;;  %v260_v5 = vld [vmem:[%s331_s3 + $0x8] sm:$0xff]  }
   0x3   :  { %234 = vmatpush3.bf16.msra.mxu0 %v257_v1  ;;  %v259_v4 = vld [vmem:[%s331_s3] sm:$0xff]  }
   0x4   :  { %235 = vmatprep.subr.bf16.mxu0 %v263_v0  ;;  %242 = vmatpush3.bf16.msra.mxu1 %v259_v4  ;;  %v216_v6 = vld [vmem:[%s332_s2] ss:$0 sm:$0xff] }
   0x5   :  { %243 = vmatprep.subr.bf16.mxu1 %v263_v0  ;;  %v162_v14 = vld [vmem:[%s333_s5] sm:$0xf] }
   0x6   :  { %v168_v15 = vsel %vm163_vm2, %v162_v14, 0  ;;  %v220_v16 = vld [vmem:[%s334_s4] ss:$0 sm:$0xff] }
   0x7   :  { %236 = vmatpush3.bf16.msra.mxu0 %v258_v2 }
   0x8   :  { %249 = vmatprep.subr.bf16.mxu0 %v263_v0  ;;  %244 = vmatpush3.bf16.msra.mxu1 %v260_v5 }
   0xa   :  { %238 = vmatmul.mubr.msk.bf16.vlgmr.msra.gmra.mrb[0].mxu0 %vm48_vm1, %v24_v3 }
   0xb   :  { %251 = vmatprep.mubr.msk.bf16.mxu0 %vm264_vm0, %v263_v0 }
  0x10   :  { %250 = vmatpush3.bf16.xpose.msra.mxu0 %v168_v15 }
  0xdd   :  { %v86_v7 = vpop.f32.mrb[0].mxu0 }
  0xde   :  { %v87_v8 = vadd.f32 %v216_v6, %v86_v7  ;;  %v239_v9 = vpop.f32.mrb[1].mxu0 }
  0xdf   :  { %v89_v10 = vpop.f32.mrb[2].mxu0 }
  0xe0   :  { %v92_v11 = vmax.f32 %v87_v8, 0.0  ;;  %v240_v12 = vpop.f32.mrb[3].mxu0 }
  0xe2   :  { %v93_v13 = vpack.c.bf16 %v92_v11, %v92_v11 }
  0xe4   :  { %246 = vmatmul.mubr.msk.bf16.vlgmr.msra.gmra.mrb[0].mxu1 %vm48_vm1, %v93_v13 }
 0x1b7   :  { %v154_v17 = vpop.f32.mrb[0].mxu1 }
 0x1b8   :  { %v155_v18 = vadd.f32 %v220_v16, %v154_v17  ;;  %v247_v19 = vpop.f32.mrb[1].mxu1 }
 0x1b9   :  { %v157_v20 = vpop.f32.mrb[2].mxu1 }
 0x1ba   :  { %261 = vtanh.f32 %v155_v18  ;;  %v248_v21 = vpop.f32.mrb[3].mxu1 }
 0x1c4   :  { %v262_v22 = vpop.eup %261 }
 0x1c5   :  { %v161_v23 = vpack.c.bf16 %v262_v22, %v262_v22 }
 0x1c7   :  { %252 = vmatmul.mubr.msk.bf16.vlgmr.msra.gmra.mrb[4].mxu0 %vm163_vm2, %v161_v23 }
 0x29a   :  { %v204_v24 = vpop.f32.mrb[4].mxu0 }
 0x29b   :  { %211 = vst.msk [vmem:[%s335_s6] sm:$0xff] %vm210_vm3, %v204_v24  ;;  %v253_v25 = vpop.f32.mrb[5].mxu0 }
 0x29c   :  { %v207_v26 = vpop.f32.mrb[6].mxu0 }
 0x29d   :  { %v254_v27 = vpop.f32.mrb[7].mxu0 }

</bundles_post_ra>
